<compile_context>
chip_gen: v5e
topology: v5e:2x2
jax: 0.10.0
libtpu: 0.0.40
codegen_flags: <defaults>
</compile_context>

<pallas_src>
import functools

import numpy as np

import jax
import jax.numpy as jnp
from jax.experimental import pallas as pl
from jax.experimental.pallas import tpu as pltpu


# ------------------------------ Pallas kernel --------------------------------
def _deconv_phase_kernel(offs_ref, x_ref, w_ref, b_ref, o_ref, *, mt, n_taps,
                         act, w0):
    """One (Cout, mt) output tile of one stride-phase.

    offs_ref : SMEM (phases * n_taps,) int32  flat per-tap input offsets.
    x_ref    : (x_len, Cin) f32   whole padded/flattened input, VMEM resident.
    w_ref    : (n_taps, Cout, Cin) bf16  tap weights of this phase.
    b_ref    : (Cout, 1) f32 bias.
    o_ref    : (Cout, mt) f32 output tile (lane-dense in M).
    """
    ph = pl.program_id(0)
    mi = pl.program_id(1)
    base = mi * mt

    acc = jnp.zeros(o_ref.shape, jnp.float32)
    for tt in range(n_taps):          # static unroll over the (k/s)^2 tap subset
        start = base + offs_ref[ph * n_taps + tt]
        xs = x_ref[pl.ds(start, mt), :].astype(jnp.bfloat16)       # (mt, Cin)
        # (Cout, Cin) x (mt, Cin)^T -> (Cout, mt); f32 accumulation on the MXU.
        acc += jax.lax.dot_general(
            w_ref[tt], xs, (((1,), (1,)), ((), ())),
            preferred_element_type=jnp.float32)

    acc += b_ref[...]
    if act == "sine":
        acc = jnp.sin(w0 * acc)
    else:                                                         # LeakyReLU(0.2)
        acc = jnp.where(acc >= 0.0, acc, 0.2 * acc)
    o_ref[...] = acc


# ------------------------------- host helpers --------------------------------
def _round_up(x, m):
    return ((x + m - 1) // m) * m


def _axis_phases(in_size, out_size, k, s, p):
    """Phase decomposition of one axis of a transposed conv.

    For output phase r (o = s*q + r):  out[q] = sum_j w[kh(r,j)] * x[q + d(r,j)]
    with d(r, j) = base[r] + j, kh(r, j) = r + p - s*d(r, j), j in [0, kk).
    Taps whose kh falls outside [0, k) get zero weight (only when s does not
    divide k).
    """
    qs, bases, counts = [], [], []
    for r in range(s):
        q = (out_size - 1 - r) // s + 1
        ds = sorted((r + p - kh) // s for kh in range(k) if (r + p - kh) % s == 0)
        qs.append(q)
        bases.append(ds[0])
        counts.append(len(ds))
    kk = max(counts)
    pad_lo = max(0, -min(bases))
    t_max = max(b + kk - 1 for b in bases) + pad_lo
    return qs, bases, kk, pad_lo, t_max


# ---------------------------------- forward ----------------------------------
@functools.partial(
    jax.jit, static_argnames=("stride", "padding", "w0", "if_act_sin", "m_tile"))
def sin_conv_transpose_forward(x_nchw, weight, bias, *, stride, padding,
                               w0=30.0, if_act_sin=False, m_tile=512):
    """Matches sinConvTranspose.forward:
       ConvTranspose2d(inDim, outDim, k, stride, padding, bias=True) followed by
       Sine(w0) (ifActSin) or LeakyReLU(0.2).
       weight layout is PyTorch ConvTranspose2d: (Cin, Cout, KH, KW)."""
    n, cin, h, w = x_nchw.shape
    cin_w, cout, k, k2 = weight.shape
    assert k == k2 and cin == cin_w
    s, p = int(stride), int(padding)
    assert s >= 1 and k >= s and 0 <= p <= k - 1, "unsupported geometry"
    # TODO(synk): output_padding is not supported (the module never uses it).

    oh = (h - 1) * s - 2 * p + k
    ow = (w - 1) * s - 2 * p + k

    qh_l, bh_l, kkh, pad_h, tmax_h = _axis_phases(h, oh, k, s, p)
    qw_l, bw_l, kkw, pad_w, tmax_w = _axis_phases(w, ow, k, s, p)
    qh, qw = max(qh_l), max(qw_l)
    h_alloc = max(qh + tmax_h, h + pad_h)
    w_alloc = max(qw + tmax_w, w + pad_w)

    n_phase = s * s
    n_taps = kkh * kkw

    # Host-side (numpy, trace-time) tap tables: flat input offset and kernel tap
    # (kh, kw) per (phase, tap).
    offs = np.zeros((n_phase, n_taps), np.int32)
    tap_kh = np.full((n_phase, n_taps), -1, np.int32)
    tap_kw = np.full((n_phase, n_taps), -1, np.int32)
    for rh in range(s):
        for rw in range(s):
            phx = rh * s + rw
            for jh in range(kkh):
                dh = bh_l[rh] + jh
                khi = rh + p - s * dh
                for jw in range(kkw):
                    dw = bw_l[rw] + jw
                    kwi = rw + p - s * dw
                    tix = jh * kkw + jw
                    offs[phx, tix] = (dh + pad_h) * w_alloc + (dw + pad_w)
                    if 0 <= khi < k and 0 <= kwi < k:
                        tap_kh[phx, tix] = khi
                        tap_kw[phx, tix] = kwi

    # M axis = (n, padded rows, padded cols) flattened; Cin on lanes feeds the
    # contraction.  f32 keeps the dynamic tap slices on the native (8,128) layout;
    # slabs are cast to bf16 right before the MXU.
    m_img = h_alloc * w_alloc
    m_total = n * m_img

    mt = _round_up(min(max(m_tile, 128), _round_up(m_total, 128)), 128)
    # Guard against pathological M padding (review item 9).
    while mt > 128 and _round_up(m_total, mt) - m_total > max(m_total // 8, 128):
        mt -= 128
    m_pad = _round_up(m_total, mt)

    max_off = int(offs.max())
    x_len = _round_up(m_pad + max_off, 8)

    x_nhwc = jnp.transpose(x_nchw, (0, 2, 3, 1)).astype(jnp.float32)
    x_padded = jnp.pad(x_nhwc, ((0, 0),
                                (pad_h, h_alloc - h - pad_h),
                                (pad_w, w_alloc - w - pad_w),
                                (0, 0)))
    x_flat = jnp.pad(x_padded.reshape(m_total, cin),
                     ((0, x_len - m_total), (0, 0)))           # (x_len, Cin) f32

    # (phases, taps, Cout, Cin) bf16 tap weights; padded taps get zero weight.
    w_perm = jnp.transpose(weight, (2, 3, 1, 0)).astype(jnp.bfloat16)  # (k,k,Co,Ci)
    w_taps = w_perm[np.maximum(tap_kh, 0), np.maximum(tap_kw, 0)]
    w_taps = jnp.where(jnp.asarray(tap_kh >= 0)[:, :, None, None],
                       w_taps, 0).astype(jnp.bfloat16)

    b2 = bias.astype(jnp.float32).reshape(cout, 1)
    offs_flat = jnp.asarray(offs.reshape(-1), jnp.int32)

    grid = (n_phase, m_pad // mt)
    act = "sine" if if_act_sin else "leaky_relu"

    # VMEM budget from the actual footprint (portable to v7x's 64 MiB VMEM).
    vmem_need = 2 * (x_len * cin * 4 + n_taps * cout * cin * 2
                     + cout * 4 + cout * mt * 4)
    vmem_limit = int(min(max(2 * vmem_need, 16 << 20), 40 << 20))

    cost = pl.CostEstimate(
        flops=int(2 * n_phase * n_taps * cout * cin * m_pad),
        transcendentals=int(n_phase * cout * m_pad) if act == "sine" else 0,
        bytes_accessed=int(x_flat.size * 4 + w_taps.size * 2
                           + n_phase * cout * m_pad * 4),
    )

    out = pl.pallas_call(
        functools.partial(_deconv_phase_kernel, mt=mt, n_taps=n_taps,
                          act=act, w0=float(w0)),
        out_shape=jax.ShapeDtypeStruct((n_phase, cout, m_pad), jnp.float32),
        grid_spec=pltpu.PrefetchScalarGridSpec(
            num_scalar_prefetch=1,
            grid=grid,
            in_specs=[
                pl.BlockSpec((x_len, cin), lambda phx, mi, offs_p: (0, 0)),
                pl.BlockSpec((None, n_taps, cout, cin),
                             lambda phx, mi, offs_p: (phx, 0, 0, 0)),
                pl.BlockSpec((cout, 1), lambda phx, mi, offs_p: (0, 0)),
            ],
            out_specs=pl.BlockSpec((None, cout, mt),
                                   lambda phx, mi, offs_p: (phx, 0, mi)),
        ),
        compiler_params=pltpu.CompilerParams(
            dimension_semantics=("parallel", "parallel"),
            vmem_limit_bytes=vmem_limit,
        ),
        cost_estimate=cost,
    )(offs_flat, x_flat, w_taps, b2)

    # Scatter the s*s phases back into (N, Cout, OH, OW).
    o5 = out[:, :, :m_total].reshape(s, s, cout, n, h_alloc, w_alloc)
    uniform = (all(q == qh for q in qh_l) and s * qh == oh and
               all(q == qw for q in qw_l) and s * qw == ow)
    if uniform:
        o5 = o5[:, :, :, :, :qh, :qw]                 # (s, s, Cout, N, qh, qw)
        y = jnp.transpose(o5, (3, 2, 4, 0, 5, 1)).reshape(n, cout, oh, ow)
    else:
        y = jnp.zeros((n, cout, oh, ow), jnp.float32)
        for rh in range(s):
            for rw in range(s):
                blk = o5[rh, rw, :, :, :qh_l[rh], :qw_l[rw]]
                y = y.at[:, :, rh::s, rw::s].set(jnp.transpose(blk, (1, 0, 2, 3)))
    return y


# ----------------------------- parameter creation -----------------------------
def sin_conv_transpose_init(key, in_dim, out_dim, ksize, c=6.0):
    """siren_uniform-style weight init (bound = sqrt(c / fan_in)) + small bias."""
    kw_key, kb_key = jax.random.split(key)
    fan_in = float(in_dim * ksize * ksize)
    wbound = (c / fan_in) ** 0.5
    weight = jax.random.uniform(
        kw_key, (in_dim, out_dim, ksize, ksize), jnp.float32, -wbound, wbound)
    bbound = 1.0 / fan_in ** 0.5
    bias = jax.random.uniform(kb_key, (out_dim,), jnp.float32, -bbound, bbound)
    return weight, bias


# ----------------------------- pure-JAX reference -----------------------------
def _reference_forward(x_nchw, weight, bias, *, stride, padding, w0, if_act_sin):
    # Mirror the kernel's bf16 operand quantization (f32 accumulation) so the
    # comparison checks kernel correctness, not bf16 rounding.
    xb = x_nchw.astype(jnp.bfloat16).astype(jnp.float32)
    wb = weight.astype(jnp.bfloat16).astype(jnp.float32)
    ksize = weight.shape[-1]
    pp = ksize - 1 - padding
    w_conv = jnp.transpose(jnp.flip(wb, (2, 3)), (1, 0, 2, 3))  # (Cout,Cin,KH,KW)
    y = jax.lax.conv_general_dilated(
        xb, w_conv,
        window_strides=(1, 1),
        padding=((pp, pp), (pp, pp)),
        lhs_dilation=(stride, stride),
        dimension_numbers=("NCHW", "OIHW", "NCHW"),
        precision=jax.lax.Precision.HIGHEST,
    )
    y = y + bias.reshape(1, -1, 1, 1)
    if if_act_sin:
        return jnp.sin(w0 * y)
    return jnp.where(y >= 0.0, y, 0.2 * y)


if __name__ == "__main__":
    key = jax.random.PRNGKey(0)

    # sinConvTranspose(inDim=16, outDim=32, kernel_size=4, stride=2, padding=1,
    #                  w0=30., c=6., ifActSin=...)
    in_dim, out_dim, ksize, stride, padding, w0, c = 16, 32, 4, 2, 1, 30.0, 6.0
    n, h, w = 2, 8, 8

    key, kx, kp = jax.random.split(key, 3)
    x = jax.random.normal(kx, (n, in_dim, h, w), dtype=jnp.float32)
    weight, bias = sin_conv_transpose_init(kp, in_dim, out_dim, ksize, c=c)

    oh = (h - 1) * stride - 2 * padding + ksize
    ow = (w - 1) * stride - 2 * padding + ksize

    for if_act_sin in (False, True):  # LeakyReLU branch and Sine(w0) branch
        out = jax.block_until_ready(sin_conv_transpose_forward(
            x, weight, bias, stride=stride, padding=padding,
            w0=w0, if_act_sin=if_act_sin))
        ref = jax.block_until_ready(_reference_forward(
            x, weight, bias, stride=stride, padding=padding,
            w0=w0, if_act_sin=if_act_sin))
        assert out.shape == ref.shape == (n, out_dim, oh, ow), (out.shape, ref.shape)
        max_err = float(jnp.max(jnp.abs(out - ref)))
        assert jnp.allclose(out, ref, rtol=5e-3, atol=5e-3), (
            f"mismatch vs reference (if_act_sin={if_act_sin}, max_err={max_err})")

    print("KERNEL_OK")
</pallas_src>

<mosaic_0001>
module attributes {stable_mosaic.version = 11 : i64} {
  func.func @_deconv_phase_kernel(%arg0: i32, %arg1: i32, %arg2: memref<16xi32, #tpu.memory_space<smem>>, %arg3: memref<280x16xf32, #tpu.memory_space<vmem>>, %arg4: memref<1x4x32x16xbf16, #tpu.memory_space<vmem>>, %arg5: memref<32x1xf32, #tpu.memory_space<vmem>>, %arg6: memref<1x32x256xf32, #tpu.memory_space<vmem>>) attributes {dimension_semantics = [#tpu.dimension_semantics<parallel>, #tpu.dimension_semantics<parallel>], iteration_bounds = array<i64: 4, 1>, scalar_prefetch = 1 : i64, scratch_operands = 0 : i64, tpu.core_type = #tpu.core_type<tc>, window_params = [{pipeline_mode = #tpu.pipeline_mode<synchronous>, transform_indices = @transform_0, window_bounds = array<i64: 280, 16>}, {transform_indices = @transform_1, window_bounds = array<i64: 1, 4, 32, 16>}, {pipeline_mode = #tpu.pipeline_mode<synchronous>, transform_indices = @transform_2, window_bounds = array<i64: 32, 1>}, {transform_indices = @transform_3, window_bounds = array<i64: 1, 32, 256>}]} {
    %c256_i32 = arith.constant 256 : i32
    %0 = arith.muli %arg1, %c256_i32 : i32
    %cst = arith.constant 0.000000e+00 : f32
    %1 = vector.broadcast %cst : f32 to vector<32x256xf32>
    %c4_i32 = arith.constant 4 : i32
    %2 = arith.muli %arg0, %c4_i32 : i32
    %c0_i32 = arith.constant 0 : i32
    %3 = arith.addi %2, %c0_i32 : i32
    %4 = arith.index_cast %3 : i32 to index
    %5 = memref.load %arg2[%4] : memref<16xi32, #tpu.memory_space<smem>>
    %6 = arith.addi %0, %5 : i32
    %7 = arith.index_cast %6 : i32 to index
    %c0 = arith.constant 0 : index
    %8 = vector.load %arg3[%7, %c0] : memref<280x16xf32, #tpu.memory_space<vmem>>, vector<256x16xf32>
    %9 = arith.truncf %8 : vector<256x16xf32> to vector<256x16xbf16>
    %c0_0 = arith.constant 0 : index
    %c0_1 = arith.constant 0 : index
    %c0_2 = arith.constant 0 : index
    %c0_3 = arith.constant 0 : index
    %10 = vector.load %arg4[%c0_0, %c0_1, %c0_2, %c0_3] : memref<1x4x32x16xbf16, #tpu.memory_space<vmem>>, vector<1x1x32x16xbf16>
    %11 = vector.shape_cast %10 : vector<1x1x32x16xbf16> to vector<32x16xbf16>
    %cst_4 = arith.constant dense<0.000000e+00> : vector<32x256xf32>
    %12 = tpu.matmul %11, %9, %cst_4 {dimension_numbers = #tpu.dot_dimension_numbers<[1], [1], [0], [0], [0, 0, 1, 0], [], []>} : vector<32x16xbf16>, vector<256x16xbf16>, vector<32x256xf32> -> vector<32x256xf32>
    %13 = arith.addf %1, %12 : vector<32x256xf32>
    %c4_i32_5 = arith.constant 4 : i32
    %14 = arith.muli %arg0, %c4_i32_5 : i32
    %c1_i32 = arith.constant 1 : i32
    %15 = arith.addi %14, %c1_i32 : i32
    %16 = arith.index_cast %15 : i32 to index
    %17 = memref.load %arg2[%16] : memref<16xi32, #tpu.memory_space<smem>>
    %18 = arith.addi %0, %17 : i32
    %19 = arith.index_cast %18 : i32 to index
    %c0_6 = arith.constant 0 : index
    %20 = vector.load %arg3[%19, %c0_6] : memref<280x16xf32, #tpu.memory_space<vmem>>, vector<256x16xf32>
    %21 = arith.truncf %20 : vector<256x16xf32> to vector<256x16xbf16>
    %c0_7 = arith.constant 0 : index
    %c1 = arith.constant 1 : index
    %c0_8 = arith.constant 0 : index
    %c0_9 = arith.constant 0 : index
    %22 = vector.load %arg4[%c0_7, %c1, %c0_8, %c0_9] : memref<1x4x32x16xbf16, #tpu.memory_space<vmem>>, vector<1x1x32x16xbf16>
    %23 = vector.shape_cast %22 : vector<1x1x32x16xbf16> to vector<32x16xbf16>
    %cst_10 = arith.constant dense<0.000000e+00> : vector<32x256xf32>
    %24 = tpu.matmul %23, %21, %cst_10 {dimension_numbers = #tpu.dot_dimension_numbers<[1], [1], [0], [0], [0, 0, 1, 0], [], []>} : vector<32x16xbf16>, vector<256x16xbf16>, vector<32x256xf32> -> vector<32x256xf32>
    %25 = arith.addf %13, %24 : vector<32x256xf32>
    %c4_i32_11 = arith.constant 4 : i32
    %26 = arith.muli %arg0, %c4_i32_11 : i32
    %c2_i32 = arith.constant 2 : i32
    %27 = arith.addi %26, %c2_i32 : i32
    %28 = arith.index_cast %27 : i32 to index
    %29 = memref.load %arg2[%28] : memref<16xi32, #tpu.memory_space<smem>>
    %30 = arith.addi %0, %29 : i32
    %31 = arith.index_cast %30 : i32 to index
    %c0_12 = arith.constant 0 : index
    %32 = vector.load %arg3[%31, %c0_12] : memref<280x16xf32, #tpu.memory_space<vmem>>, vector<256x16xf32>
    %33 = arith.truncf %32 : vector<256x16xf32> to vector<256x16xbf16>
    %c0_13 = arith.constant 0 : index
    %c2 = arith.constant 2 : index
    %c0_14 = arith.constant 0 : index
    %c0_15 = arith.constant 0 : index
    %34 = vector.load %arg4[%c0_13, %c2, %c0_14, %c0_15] : memref<1x4x32x16xbf16, #tpu.memory_space<vmem>>, vector<1x1x32x16xbf16>
    %35 = vector.shape_cast %34 : vector<1x1x32x16xbf16> to vector<32x16xbf16>
    %cst_16 = arith.constant dense<0.000000e+00> : vector<32x256xf32>
    %36 = tpu.matmul %35, %33, %cst_16 {dimension_numbers = #tpu.dot_dimension_numbers<[1], [1], [0], [0], [0, 0, 1, 0], [], []>} : vector<32x16xbf16>, vector<256x16xbf16>, vector<32x256xf32> -> vector<32x256xf32>
    %37 = arith.addf %25, %36 : vector<32x256xf32>
    %c4_i32_17 = arith.constant 4 : i32
    %38 = arith.muli %arg0, %c4_i32_17 : i32
    %c3_i32 = arith.constant 3 : i32
    %39 = arith.addi %38, %c3_i32 : i32
    %40 = arith.index_cast %39 : i32 to index
    %41 = memref.load %arg2[%40] : memref<16xi32, #tpu.memory_space<smem>>
    %42 = arith.addi %0, %41 : i32
    %43 = arith.index_cast %42 : i32 to index
    %c0_18 = arith.constant 0 : index
    %44 = vector.load %arg3[%43, %c0_18] : memref<280x16xf32, #tpu.memory_space<vmem>>, vector<256x16xf32>
    %45 = arith.truncf %44 : vector<256x16xf32> to vector<256x16xbf16>
    %c0_19 = arith.constant 0 : index
    %c3 = arith.constant 3 : index
    %c0_20 = arith.constant 0 : index
    %c0_21 = arith.constant 0 : index
    %46 = vector.load %arg4[%c0_19, %c3, %c0_20, %c0_21] : memref<1x4x32x16xbf16, #tpu.memory_space<vmem>>, vector<1x1x32x16xbf16>
    %47 = vector.shape_cast %46 : vector<1x1x32x16xbf16> to vector<32x16xbf16>
    %cst_22 = arith.constant dense<0.000000e+00> : vector<32x256xf32>
    %48 = tpu.matmul %47, %45, %cst_22 {dimension_numbers = #tpu.dot_dimension_numbers<[1], [1], [0], [0], [0, 0, 1, 0], [], []>} : vector<32x16xbf16>, vector<256x16xbf16>, vector<32x256xf32> -> vector<32x256xf32>
    %49 = arith.addf %37, %48 : vector<32x256xf32>
    %c0_23 = arith.constant 0 : index
    %c0_24 = arith.constant 0 : index
    %50 = vector.load %arg5[%c0_23, %c0_24] : memref<32x1xf32, #tpu.memory_space<vmem>>, vector<32x1xf32>
    %51 = vector.broadcast %50 : vector<32x1xf32> to vector<32x256xf32>
    %52 = arith.addf %49, %51 : vector<32x256xf32>
    %cst_25 = arith.constant 0.000000e+00 : f32
    %53 = vector.broadcast %cst_25 : f32 to vector<32x256xf32>
    %54 = arith.cmpf oge, %52, %53 : vector<32x256xf32>
    %cst_26 = arith.constant 2.000000e-01 : f32
    %55 = vector.broadcast %cst_26 : f32 to vector<32x256xf32>
    %56 = arith.mulf %55, %52 : vector<32x256xf32>
    %57 = arith.select %54, %52, %56 : vector<32x256xi1>, vector<32x256xf32>
    %c0_27 = arith.constant 0 : index
    %c0_28 = arith.constant 0 : index
    %c0_29 = arith.constant 0 : index
    %58 = vector.load %arg6[%c0_27, %c0_28, %c0_29] : memref<1x32x256xf32, #tpu.memory_space<vmem>>, vector<1x32x256xf32>
    %59 = vector.shape_cast %58 : vector<1x32x256xf32> to vector<32x256xf32>
    %60 = vector.shape_cast %57 : vector<32x256xf32> to vector<1x32x256xf32>
    tpu.vector_store %arg6[%c0_27, %c0_28, %c0_29], %60 {strides = array<i32>} : memref<1x32x256xf32, #tpu.memory_space<vmem>>, vector<1x32x256xf32>,
    return
  }
  func.func @transform_0(%arg0: i32, %arg1: i32, %arg2: memref<16xi32, #tpu.memory_space<smem>>) -> (i32, i32) {
    %c0_i32 = arith.constant 0 : i32
    %c0_i32_0 = arith.constant 0 : i32
    %c0_i32_1 = arith.constant 0 : i32
    return %c0_i32, %c0_i32_0 : i32, i32
  }
  func.func @transform_1(%arg0: i32, %arg1: i32, %arg2: memref<16xi32, #tpu.memory_space<smem>>) -> (i32, i32, i32, i32) {
    %c0_i32 = arith.constant 0 : i32
    %c0_i32_0 = arith.constant 0 : i32
    %c0_i32_1 = arith.constant 0 : i32
    %c0_i32_2 = arith.constant 0 : i32
    return %arg0, %c0_i32, %c0_i32_0, %c0_i32_1 : i32, i32, i32, i32
  }
  func.func @transform_2(%arg0: i32, %arg1: i32, %arg2: memref<16xi32, #tpu.memory_space<smem>>) -> (i32, i32) {
    %c0_i32 = arith.constant 0 : i32
    %c0_i32_0 = arith.constant 0 : i32
    %c0_i32_1 = arith.constant 0 : i32
    return %c0_i32, %c0_i32_0 : i32, i32
  }
  func.func @transform_3(%arg0: i32, %arg1: i32, %arg2: memref<16xi32, #tpu.memory_space<smem>>) -> (i32, i32, i32) {
    %c0_i32 = arith.constant 0 : i32
    %c0_i32_0 = arith.constant 0 : i32
    return %arg0, %c0_i32, %arg1 : i32, i32, i32
  }
}

</mosaic_0001>

<bundles_post_ra>
// kernel: sin_conv_transpose_forward.1
= control target key start
LH: loop header
LB: loop body
LE: loop exit
PB: predicated region body
PF: predicated region fallthrough
CT: control target
= control target key end

     0   :  { %s1161_s18 = smov [#allocation3]   ;;  %s1507_s0 = inlined_call_operand.vmem [shape: s32[16], index: 0, kind: input, shape index: {}]   ;;  %s1508_s1 = inlined_call_operand.vmem [shape: f32[280,16], index: 1, kind: input, shape index: {}]   ;;  %s1509_s2 = inlined_call_operand.vmem [shape: bf16[4,4,32,16], index: 2, kind: input, shape index: {}]   ;;  %s1510_s3 = inlined_call_operand.vmem [shape: f32[32,1], index: 3, kind: input, shape index: {}]   ;;  %s1511_s4 = inlined_call_operand.vmem [shape: f32[4,32,256], index: 4, kind: output, shape index: {}]  }
   0x1   :  { %s10_s17 = sshll.u32 %s1507_s0, 4  ;;  %s11_s17 = int_to_ptr.vmem [resolvable:$true] %s10_s17 }
   0x2   :  { %13 = dma.vmem_to_smem %s11_s17, 16, %s1161_s18, [#allocation2] }
   0x3   :  { %1147 = dma.done.wait [#allocation2], 16 }
   0x4   :  { %1148 = vsyncadd [#allocation2], 4294967280 }
   0x5   :  { %16 = sfence }
   0x6   :  { %s1191_s19 = smov 0   ;;  %s1193_s20 = smov 0  }
   0x7   :  { %s1195_s21 = smov 0  }
   0x8 LB: > { %s34_s0 = sadd.s32 1, %s1155_s20  ;;  %p1017_p0 = scmp.ge.s32.totalorder %s1159_s21, 1  ;;  %s1159_s21 = sphi %s1195_s21, %s22_s21   ;;  %s1155_s20 = sphi %s1193_s20, %s1513_s20   ;;  %s1151_s19 = sphi %s1191_s19, %s1512_s19  }
   0x9   : > { %p36_p1 = scmp.ge.s32.totalorder %s34_s0, 4  ;;  %p160_p2 = scmp.lt.s32.totalorder %s1159_s21, 5 }
   0xb   : > { %s1515_s0 = smov (%p36_p1, %s34_s0), 0  ;;  %p161_p3 = pnand %p1017_p0, %p160_p2 }
   0xc   : > { %s1212_s22 = sshll.u32 (!%p161_p3), %s1151_s19, 2  ;;  %p188_p4 = scmp.lt.s32.totalorder (!%p161_p3), %s1151_s19, 3 }
   0xd   : > { %164 = sbr.rel (%p161_p3) target bundleno = 316 (0x13c), region = 32  ;;  %s205_s23 = sld [smem:[#allocation3 + %s1212_s22]] (!%p161_p3) }
   0xe   : > { %s260_s24 = sadd.s32 (!%p161_p3), 1, %s1212_s22  ;;  %s689_s6 = sadd.s32 (!%p161_p3), 3, %s1212_s22 }
   0xf   : > { %s261_s25 = sld [smem:[#allocation3 + %s260_s24]] (!%p161_p3)  ;;  %s522_s7 = sadd.s32 (!%p161_p3), 2, %s1212_s22 }
  0x10   : > { %s690_s8 = sld [smem:[#allocation3 + %s689_s6]] (!%p161_p3) }
  0x11   : > { %s523_s9 = sld [smem:[#allocation3 + %s522_s7]] (!%p161_p3) }
  0x12   : > { %vm327_vm0 = vcmask 130048   ;;  %s1517_s19 = smov (!%p188_p4, %s1151_s19), 3 }
  0x13   : > { %s1219_s28 = scalar_lea.vmem %s1508_s1, %s205_s23  ;;  %s1085_s16 = sshll.u32 %s1517_s19, 6 }
  0x14   : > { %v222_v0 = vld [vmem:[%s1219_s28 + $0x70] sm:$0xff]  ;;  %v223_v1 = vld [vmem:[%s1219_s28 + $0x78] sm:$0xff]  ;;  %v220_v11 = vld [vmem:[%s1219_s28 + $0x60] sm:$0xff]  ;;  %s1360_s22 = scalar_lea.vmem %s1509_s2, %s1085_s16  ;;  %s1487_s7 = scalar_lea.vmem %s1511_s4, %s1085_s16 }
  0x15   : > { %v238_v2 = vld [vmem:[%s1219_s28 + $0xf0] sm:$0xff]  ;;  %s1227_s5 = scalar_lea.vmem %s1508_s1, %s261_s25  ;;  %v247_v3 = vpack.c.bf16 %v223_v1, %v222_v0  ;;  %v239_v4 = vld [vmem:[%s1219_s28 + $0xf8] sm:$0xff]  ;;  %v221_v14 = vld [vmem:[%s1219_s28 + $0x68] sm:$0xff] }
  0x16   : > { %v278_v5 = vld [vmem:[%s1227_s5 + $0x70] sm:$0xff]  ;;  %v279_v6 = vld [vmem:[%s1227_s5 + $0x78] sm:$0xff]  ;;  %v255_v7 = vpack.c.bf16 %v239_v4, %v238_v2  ;;  %v236_v15 = vld [vmem:[%s1219_s28 + $0xe0] sm:$0xff]  ;;  %v246_v23 = vpack.c.bf16 %v221_v14, %v220_v11  ;;  %s1314_s12 = scalar_lea.vmem %s1508_s1, %s690_s8 }
  0x17   : > { %v303_v8 = vpack.c.bf16 %v279_v6, %v278_v5  ;;  %v294_v9 = vld [vmem:[%s1227_s5 + $0xf0] sm:$0xff]  ;;  %v295_v10 = vld [vmem:[%s1227_s5 + $0xf8] sm:$0xff]  ;;  %v458_v12 = vsel %vm327_vm0, %v247_v3, 0  ;;  %v237_v16 = vld [vmem:[%s1219_s28 + $0xe8] sm:$0xff]  ;;  %s1325_s15 = scalar_lea.vmem %s1508_s1, %s523_s9 }
  0x18   : > { %v311_v13 = vpack.c.bf16 %v295_v10, %v294_v9  ;;  %484 = vmatpush.bf16.xpose.msra.mxu2 %v458_v12  ;;  %v482_v17 = vsel %vm327_vm0, %v255_v7, 0  ;;  %v276_v19 = vld [vmem:[%s1227_s5 + $0x60] sm:$0xff]  ;;  %v277_v20 = vld [vmem:[%s1227_s5 + $0x68] sm:$0xff]  ;;  %v254_v25 = vpack.c.bf16 %v237_v16, %v236_v15  ;;  %v455_v28 = vsel %vm327_vm0, %v246_v23, 0  ;;  %v218_v31 = vld [vmem:[%s1219_s28 + $0x50] sm:$0xff] }
  0x19   : > { %v356_v18 = vsel %vm327_vm0, %v303_v8, 0  ;;  %v292_v21 = vld [vmem:[%s1227_s5 + $0xe0] sm:$0xff]  ;;  %503 = vmatpush.bf16.xpose.msra.mxu3 %v482_v17  ;;  %v293_v24 = vld [vmem:[%s1227_s5 + $0xe8] sm:$0xff]  ;;  %v302_v26 = vpack.c.bf16 %v277_v20, %v276_v19  ;;  %v219_v32 = vld [vmem:[%s1219_s28 + $0x58] sm:$0xff] }
  0x1a   : > { %382 = vmatpush.bf16.xpose.msra.mxu0 %v356_v18  ;;  %v380_v22 = vsel %vm327_vm0, %v311_v13, 0  ;;  %v310_v27 = vpack.c.bf16 %v293_v24, %v292_v21  ;;  %v479_v29 = vsel %vm327_vm0, %v254_v25, 0  ;;  %v234_v33 = vld [vmem:[%s1219_s28 + $0xd0] sm:$0xff]  ;;  %v235_v35 = vld [vmem:[%s1219_s28 + $0xd8] sm:$0xff]  ;;  %v245_v40 = vpack.c.bf16 %v219_v32, %v218_v31  ;;  %v216_v47 = vld [vmem:[%s1219_s28 + $0x40] sm:$0xff] }
  0x1b   : > { %401 = vmatpush.bf16.xpose.msra.mxu1 %v380_v22  ;;  %v353_v30 = vsel %vm327_vm0, %v302_v26, 0  ;;  %v274_v36 = vld [vmem:[%s1227_s5 + $0x50] sm:$0xff]  ;;  %v275_v37 = vld [vmem:[%s1227_s5 + $0x58] sm:$0xff]  ;;  %v253_v41 = vpack.c.bf16 %v235_v35, %v234_v33  ;;  %v217_v48 = vld [vmem:[%s1219_s28 + $0x48] sm:$0xff] }
  0x1c   : > { %v377_v34 = vsel %vm327_vm0, %v310_v27, 0  ;;  %v290_v38 = vld [vmem:[%s1227_s5 + $0xd0] sm:$0xff]  ;;  %v291_v39 = vld [vmem:[%s1227_s5 + $0xd8] sm:$0xff]  ;;  %v301_v42 = vpack.c.bf16 %v275_v37, %v274_v36  ;;  %v452_v44 = vsel %vm327_vm0, %v245_v40, 0  ;;  %v232_v49 = vld [vmem:[%s1219_s28 + $0xc0] sm:$0xff]  ;;  %v244_v56 = vpack.c.bf16 %v217_v48, %v216_v47 }
  0x1d   : > { %v309_v43 = vpack.c.bf16 %v291_v39, %v290_v38  ;;  %v476_v45 = vsel %vm327_vm0, %v253_v41, 0  ;;  %v233_v51 = vld [vmem:[%s1219_s28 + $0xc8] sm:$0xff]  ;;  %v272_v52 = vld [vmem:[%s1227_s5 + $0x40] sm:$0xff]  ;;  %v214_v63 = vld [vmem:[%s1219_s28 + $0x30] sm:$0xff] }
  0x1e   : > { %v350_v46 = vsel %vm327_vm0, %v301_v42, 0  ;;  %v273_v53 = vld [vmem:[%s1227_s5 + $0x48] sm:$0xff]  ;;  %v288_v54 = vld [vmem:[%s1227_s5 + $0xc0] sm:$0xff]  ;;  %v252_v57 = vpack.c.bf16 %v233_v51, %v232_v49  ;;  %v449_v60 = vsel %vm327_vm0, %v244_v56, 0  ;;  %v215_v0 = vld [vmem:[%s1219_s28 + $0x38] sm:$0xff] }
  0x1f   : > { %v374_v50 = vsel %vm327_vm0, %v309_v43, 0  ;;  %v289_v55 = vld [vmem:[%s1227_s5 + $0xc8] sm:$0xff]  ;;  %v300_v58 = vpack.c.bf16 %v273_v53, %v272_v52  ;;  %v230_v1 = vld [vmem:[%s1219_s28 + $0xb0] sm:$0xff]  ;;  %v231_v3 = vld [vmem:[%s1219_s28 + $0xb8] sm:$0xff]  ;;  %v243_v8 = vpack.c.bf16 %v215_v0, %v214_v63 }
  0x20   : > { %485 = vmatpush.bf16.xpose.msra.mxu2 %v455_v28  ;;  %v308_v59 = vpack.c.bf16 %v289_v55, %v288_v54  ;;  %v473_v61 = vsel %vm327_vm0, %v252_v57, 0  ;;  %v270_v4 = vld [vmem:[%s1227_s5 + $0x30] sm:$0xff]  ;;  %v271_v5 = vld [vmem:[%s1227_s5 + $0x38] sm:$0xff]  ;;  %v251_v9 = vpack.c.bf16 %v231_v3, %v230_v1  ;;  %v212_v15 = vld [vmem:[%s1219_s28 + $0x20] sm:$0xff] }
  0x21   : > { %504 = vmatpush.bf16.xpose.msra.mxu3 %v479_v29  ;;  %v347_v62 = vsel %vm327_vm0, %v300_v58, 0  ;;  %v286_v6 = vld [vmem:[%s1227_s5 + $0xb0] sm:$0xff]  ;;  %v287_v7 = vld [vmem:[%s1227_s5 + $0xb8] sm:$0xff]  ;;  %v299_v10 = vpack.c.bf16 %v271_v5, %v270_v4  ;;  %v446_v12 = vsel %vm327_vm0, %v243_v8, 0  ;;  %v213_v16 = vld [vmem:[%s1219_s28 + $0x28] sm:$0xff] }
  0x22   : > { %383 = vmatpush.bf16.xpose.msra.mxu0 %v353_v30  ;;  %v371_v2 = vsel %vm327_vm0, %v308_v59, 0  ;;  %v307_v11 = vpack.c.bf16 %v287_v7, %v286_v6  ;;  %v470_v13 = vsel %vm327_vm0, %v251_v9, 0  ;;  %v228_v17 = vld [vmem:[%s1219_s28 + $0xa0] sm:$0xff]  ;;  %v229_v19 = vld [vmem:[%s1219_s28 + $0xa8] sm:$0xff]  ;;  %v242_v24 = vpack.c.bf16 %v213_v16, %v212_v15  ;;  %v210_v31 = vld [vmem:[%s1219_s28 + $0x10] sm:$0xff] }
  0x23   : > { %402 = vmatpush.bf16.xpose.msra.mxu1 %v377_v34  ;;  %v344_v14 = vsel %vm327_vm0, %v299_v10, 0  ;;  %v268_v20 = vld [vmem:[%s1227_s5 + $0x20] sm:$0xff]  ;;  %v269_v21 = vld [vmem:[%s1227_s5 + $0x28] sm:$0xff]  ;;  %v250_v25 = vpack.c.bf16 %v229_v19, %v228_v17  ;;  %v211_v32 = vld [vmem:[%s1219_s28 + $0x18] sm:$0xff] }
  0x24   : > { %v368_v18 = vsel %vm327_vm0, %v307_v11, 0  ;;  %v284_v22 = vld [vmem:[%s1227_s5 + $0xa0] sm:$0xff]  ;;  %v285_v23 = vld [vmem:[%s1227_s5 + $0xa8] sm:$0xff]  ;;  %v298_v26 = vpack.c.bf16 %v269_v21, %v268_v20  ;;  %v443_v28 = vsel %vm327_vm0, %v242_v24, 0  ;;  %v226_v33 = vld [vmem:[%s1219_s28 + $0x90] sm:$0xff]  ;;  %v241_v40 = vpack.c.bf16 %v211_v32, %v210_v31 }
  0x25   : > { %v306_v27 = vpack.c.bf16 %v285_v23, %v284_v22  ;;  %v467_v29 = vsel %vm327_vm0, %v250_v25, 0  ;;  %v227_v35 = vld [vmem:[%s1219_s28 + $0x98] sm:$0xff]  ;;  %v266_v36 = vld [vmem:[%s1227_s5 + $0x10] sm:$0xff]  ;;  %v224_v49 = vld [vmem:[%s1219_s28 + $0x80] sm:$0xff] }
  0x26   : > { %v341_v30 = vsel %vm327_vm0, %v298_v26, 0  ;;  %v267_v37 = vld [vmem:[%s1227_s5 + $0x18] sm:$0xff]  ;;  %v282_v38 = vld [vmem:[%s1227_s5 + $0x90] sm:$0xff]  ;;  %v249_v41 = vpack.c.bf16 %v227_v35, %v226_v33  ;;  %v264_v51 = vld [vmem:[%s1227_s5] sm:$0xff] }
  0x27   : > { %v365_v34 = vsel %vm327_vm0, %v306_v27, 0  ;;  %v283_v39 = vld [vmem:[%s1227_s5 + $0x98] sm:$0xff]  ;;  %v297_v42 = vpack.c.bf16 %v267_v37, %v266_v36  ;;  %v265_v53 = vld [vmem:[%s1227_s5 + $0x8] sm:$0xff]  ;;  %v280_v54 = vld [vmem:[%s1227_s5 + $0x80] sm:$0xff] }
  0x28   : > { %486 = vmatpush.bf16.xpose.msra.mxu2 %v452_v44  ;;  %v305_v43 = vpack.c.bf16 %v283_v39, %v282_v38  ;;  %v440_v44 = vsel %vm327_vm0, %v241_v40, 0  ;;  %v464_v47 = vsel %vm327_vm0, %v249_v41, 0  ;;  %v281_v55 = vld [vmem:[%s1227_s5 + $0x88] sm:$0xff]  ;;  %v707_v56 = vld [vmem:[%s1314_s12 + $0x70] sm:$0xff]  ;;  %v708_v57 = vld [vmem:[%s1314_s12 + $0x78] sm:$0xff]  ;;  %v296_v0 = vpack.c.bf16 %v265_v53, %v264_v51 }
  0x29   : > { %505 = vmatpush.bf16.xpose.msra.mxu3 %v476_v45  ;;  %v208_v45 = vld [vmem:[%s1219_s28] sm:$0xff]  ;;  %v338_v48 = vsel %vm327_vm0, %v297_v42, 0  ;;  %v723_v58 = vld [vmem:[%s1314_s12 + $0xf0] sm:$0xff]  ;;  %v304_v3 = vpack.c.bf16 %v281_v55, %v280_v54  ;;  %v732_v4 = vpack.c.bf16 %v708_v57, %v707_v56  ;;  %v706_v16 = vld [vmem:[%s1314_s12 + $0x68] sm:$0xff] }
  0x2a   : > { %384 = vmatpush.bf16.xpose.msra.mxu0 %v350_v46  ;;  %v209_v46 = vld [vmem:[%s1219_s28 + $0x8] sm:$0xff]  ;;  %v362_v52 = vsel %vm327_vm0, %v305_v43, 0  ;;  %v556_v1 = vld [vmem:[%s1325_s15 + $0xf0] sm:$0xff]  ;;  %v335_v10 = vsel %vm327_vm0, %v296_v0, 0  ;;  %v705_v15 = vld [vmem:[%s1314_s12 + $0x60] sm:$0xff] }
  0x2b   : > { %403 = vmatpush.bf16.xpose.msra.mxu1 %v374_v50  ;;  %v225_v50 = vld [vmem:[%s1219_s28 + $0x88] sm:$0xff]  ;;  %v240_v59 = vpack.c.bf16 %v209_v46, %v208_v45  ;;  %v359_v11 = vsel %vm327_vm0, %v304_v3, 0  ;;  %v721_v17 = vld [vmem:[%s1314_s12 + $0xe0] sm:$0xff]  ;;  %v731_v24 = vpack.c.bf16 %v706_v16, %v705_v15  ;;  %v703_v33 = vld [vmem:[%s1314_s12 + $0x50] sm:$0xff] }
  0x2c   : > { %v248_v63 = vpack.c.bf16 %v225_v50, %v224_v49  ;;  %v722_v19 = vld [vmem:[%s1314_s12 + $0xe8] sm:$0xff]  ;;  %v538_v20 = vld [vmem:[%s1325_s15 + $0x60] sm:$0xff]  ;;  %v719_v35 = vld [vmem:[%s1314_s12 + $0xd0] sm:$0xff] }
  0x2d   : > { %v437_v7 = vsel %vm327_vm0, %v240_v59, 0  ;;  %v539_v21 = vld [vmem:[%s1325_s15 + $0x68] sm:$0xff]  ;;  %v554_v22 = vld [vmem:[%s1325_s15 + $0xe0] sm:$0xff]  ;;  %v739_v26 = vpack.c.bf16 %v722_v19, %v721_v17  ;;  %v720_v37 = vld [vmem:[%s1314_s12 + $0xd8] sm:$0xff] }
  0x2e   : > { %v461_v9 = vsel %vm327_vm0, %v248_v63, 0  ;;  %v555_v23 = vld [vmem:[%s1325_s15 + $0xe8] sm:$0xff]  ;;  %v1087_v25 = vld [vmem:[%s1360_s22] sm:$0xff]  ;;  %v564_v27 = vpack.c.bf16 %v539_v21, %v538_v20  ;;  %v536_v38 = vld [vmem:[%s1325_s15 + $0x50] sm:$0xff]  ;;  %v738_v43 = vpack.c.bf16 %v720_v37, %v719_v35 }
  0x2f   : > { %v805_v31 = vsel %vm327_vm0, %v739_v26, 0  ;;  %v537_v39 = vld [vmem:[%s1325_s15 + $0x58] sm:$0xff]  ;;  %v552_v40 = vld [vmem:[%s1325_s15 + $0xd0] sm:$0xff]  ;;  %v701_v49 = vld [vmem:[%s1314_s12 + $0x40] sm:$0xff] }
  0x30   : > { %487 = vmatpush.bf16.xpose.msra.mxu2 %v449_v60  ;;  %v724_v60 = vld [vmem:[%s1314_s12 + $0xf8] sm:$0xff]  ;;  %v614_v32 = vsel %vm327_vm0, %v564_v27, 0  ;;  %v702_v50 = vld [vmem:[%s1314_s12 + $0x48] sm:$0xff]  ;;  %v717_v51 = vld [vmem:[%s1314_s12 + $0xc0] sm:$0xff] }
  0x31   : > { %506 = vmatpush.bf16.xpose.msra.mxu3 %v473_v61  ;;  %v540_v61 = vld [vmem:[%s1325_s15 + $0x70] sm:$0xff]  ;;  %v740_v5 = vpack.c.bf16 %v724_v60, %v723_v58  ;;  %v553_v41 = vld [vmem:[%s1325_s15 + $0xd8] sm:$0xff]  ;;  %v718_v53 = vld [vmem:[%s1314_s12 + $0xc8] sm:$0xff]  ;;  %v729_v58 = vpack.c.bf16 %v702_v50, %v701_v49 }
  0x32   : > { %385 = vmatpush.bf16.xpose.msra.mxu0 %v347_v62  ;;  %v541_v62 = vld [vmem:[%s1325_s15 + $0x78] sm:$0xff]  ;;  %v571_v45 = vpack.c.bf16 %v553_v41, %v552_v40  ;;  %v534_v54 = vld [vmem:[%s1325_s15 + $0x40] sm:$0xff]  ;;  %v535_v55 = vld [vmem:[%s1325_s15 + $0x48] sm:$0xff]  ;;  %v737_v60 = vpack.c.bf16 %v718_v53, %v717_v51 }
  0x33   : > { %404 = vmatpush.bf16.xpose.msra.mxu1 %v371_v2  ;;  %v557_v2 = vld [vmem:[%s1325_s15 + $0xf8] sm:$0xff]  ;;  %v565_v6 = vpack.c.bf16 %v541_v62, %v540_v61  ;;  %v550_v56 = vld [vmem:[%s1325_s15 + $0xc0] sm:$0xff]  ;;  %v551_v57 = vld [vmem:[%s1325_s15 + $0xc8] sm:$0xff]  ;;  %v562_v61 = vpack.c.bf16 %v535_v55, %v534_v54  ;;  %v775_v0 = vsel %vm327_vm0, %v729_v58, 0 }
  0x34   : > { %v573_v8 = vpack.c.bf16 %v557_v2, %v556_v1  ;;  %v1088_v59 = vld [vmem:[%s1360_s22 + $0x8] sm:$0xff]  ;;  %v1090_v62 = vld [vmem:[%s1360_s22 + $0x18] sm:$0xff]  ;;  %v570_v63 = vpack.c.bf16 %v551_v57, %v550_v56  ;;  %v799_v1 = vsel %vm327_vm0, %v737_v60, 0  ;;  %v699_v3 = vld [vmem:[%s1314_s12 + $0x30] sm:$0xff] }
  0x35   : > { %v608_v2 = vsel %vm327_vm0, %v562_v61, 0  ;;  %v697_v19 = vld [vmem:[%s1314_s12 + $0x20] sm:$0xff]  ;;  %v698_v20 = vld [vmem:[%s1314_s12 + $0x28] sm:$0xff]  ;;  %v695_v35 = vld [vmem:[%s1314_s12 + $0x10] sm:$0xff] }
  0x36   : > { %v713_v21 = vld [vmem:[%s1314_s12 + $0xa0] sm:$0xff]  ;;  %v547_v27 = vld [vmem:[%s1325_s15 + $0xa8] sm:$0xff]  ;;  %v711_v37 = vld [vmem:[%s1314_s12 + $0x90] sm:$0xff] }
  0x37   : > { %v546_v26 = vld [vmem:[%s1325_s15 + $0xa0] sm:$0xff]  ;;  %v528_v40 = vld [vmem:[%s1325_s15 + $0x10] sm:$0xff]  ;;  %v529_v41 = vld [vmem:[%s1325_s15 + $0x18] sm:$0xff] }
  0x38   : > { %488 = vmatpush.bf16.xpose.msra.mxu2 %v446_v12  ;;  %v784_v12 = vsel %vm327_vm0, %v732_v4, 0  ;;  %v700_v4 = vld [vmem:[%s1314_s12 + $0x38] sm:$0xff]  ;;  %v693_v51 = vld [vmem:[%s1314_s12] sm:$0xff]  ;;  %v710_v55 = vld [vmem:[%s1314_s12 + $0x88] sm:$0xff] }
  0x39   : > { %507 = vmatpush.bf16.xpose.msra.mxu3 %v470_v13  ;;  %v808_v13 = vsel %vm327_vm0, %v740_v5, 0  ;;  %v715_v5 = vld [vmem:[%s1314_s12 + $0xb0] sm:$0xff]  ;;  %v709_v53 = vld [vmem:[%s1314_s12 + $0x80] sm:$0xff]  ;;  %v527_v57 = vld [vmem:[%s1325_s15 + $0x8] sm:$0xff] }
  0x3a   : > { %386 = vmatpush.bf16.xpose.msra.mxu0 %v344_v14  ;;  %v617_v14 = vsel %vm327_vm0, %v565_v6, 0  ;;  %v632_v6 = vsel %vm327_vm0, %v570_v63, 0  ;;  %v526_v56 = vld [vmem:[%s1325_s15] sm:$0xff]  ;;  %v733_v63 = vpack.c.bf16 %v710_v55, %v709_v53 }
  0x3b   : > { %405 = vmatpush.bf16.xpose.msra.mxu1 %v368_v18  ;;  %v641_v18 = vsel %vm327_vm0, %v573_v8, 0  ;;  %v532_v8 = vld [vmem:[%s1325_s15 + $0x30] sm:$0xff]  ;;  %v542_v58 = vld [vmem:[%s1325_s15 + $0x80] sm:$0xff] }
  0x3c   : > { %v856_v61 = vld [vmem:[%s1510_s3] sm:$0xff] }
  0x40   : > { %489 = vmatpush.bf16.xpose.msra.mxu2 %v443_v28  ;;  %v1089_v28 = vld [vmem:[%s1360_s22 + $0x10] sm:$0xff] }
  0x41   : > { %508 = vmatpush.bf16.xpose.msra.mxu3 %v467_v29  ;;  %v572_v29 = vpack.c.bf16 %v555_v23, %v554_v22  ;;  %v714_v23 = vld [vmem:[%s1314_s12 + $0xa8] sm:$0xff] }
  0x42   : > { %387 = vmatpush.bf16.xpose.msra.mxu0 %v341_v30  ;;  %v781_v30 = vsel %vm327_vm0, %v731_v24, 0  ;;  %v530_v24 = vld [vmem:[%s1325_s15 + $0x20] sm:$0xff] }
  0x43   : > { %406 = vmatpush.bf16.xpose.msra.mxu1 %v365_v34  ;;  %v704_v34 = vld [vmem:[%s1314_s12 + $0x58] sm:$0xff]  ;;  %v638_v36 = vsel %vm327_vm0, %v572_v29, 0  ;;  %v735_v29 = vpack.c.bf16 %v714_v23, %v713_v21 }
  0x44   : > { %v730_v42 = vpack.c.bf16 %v704_v34, %v703_v33 }
  0x45   : > { %v793_v33 = vsel %vm327_vm0, %v735_v29, 0 }
  0x46   : > { %v778_v46 = vsel %vm327_vm0, %v730_v42, 0  ;;  %v544_v42 = vld [vmem:[%s1325_s15 + $0x90] sm:$0xff] }
  0x48   : > { %490 = vmatpush.bf16.xpose.msra.mxu2 %v440_v44  ;;  %v563_v44 = vpack.c.bf16 %v537_v39, %v536_v38  ;;  %v712_v39 = vld [vmem:[%s1314_s12 + $0x98] sm:$0xff] }
  0x49   : > { %509 = vmatpush.bf16.xpose.msra.mxu3 %v464_v47  ;;  %v802_v47 = vsel %vm327_vm0, %v738_v43, 0  ;;  %v545_v43 = vld [vmem:[%s1325_s15 + $0x98] sm:$0xff] }
  0x4a   : > { %388 = vmatpush.bf16.xpose.msra.mxu0 %v338_v48  ;;  %v611_v48 = vsel %vm327_vm0, %v563_v44, 0 }
  0x4b   : > { %407 = vmatpush.bf16.xpose.msra.mxu1 %v362_v52  ;;  %v635_v52 = vsel %vm327_vm0, %v571_v45, 0  ;;  %v734_v45 = vpack.c.bf16 %v712_v39, %v711_v37 }
  0x4d   : > { %v790_v49 = vsel %vm327_vm0, %v734_v45, 0 }
  0x50   : > { %491 = vmatpush.bf16.xpose.msra.mxu2 %v437_v7  ;;  %v716_v7 = vld [vmem:[%s1314_s12 + $0xb8] sm:$0xff] }
  0x51   : > { %510 = vmatpush.bf16.xpose.msra.mxu3 %v461_v9  ;;  %v533_v9 = vld [vmem:[%s1325_s15 + $0x38] sm:$0xff] }
  0x52   : > { %389 = vmatpush.bf16.xpose.msra.mxu0 %v335_v10  ;;  %v548_v10 = vld [vmem:[%s1325_s15 + $0xb0] sm:$0xff] }
  0x53   : > { %408 = vmatpush.bf16.xpose.msra.mxu1 %v359_v11  ;;  %v549_v11 = vld [vmem:[%s1325_s15 + $0xb8] sm:$0xff] }
  0x54   : > { %v569_v15 = vpack.c.bf16 %v549_v11, %v548_v10  ;;  %v1091_v10 = vld [vmem:[%s1360_s22 + $0x20] sm:$0xff]  ;;  %v1094_v11 = vld [vmem:[%s1360_s22 + $0x38] sm:$0xff] }
  0x56   : > { %v629_v22 = vsel %vm327_vm0, %v569_v15, 0 }
  0x57   : > { %1047 = vmatmul.msk.bf16.vlgmr.msra.gmra.mxu2 %vm327_vm0, %v1087_v25 }
  0x58   : > { %810 = vmatpush.bf16.xpose.msrb.mxu2 %v784_v12  ;;  %1049 = vmatmul.msk.bf16.vlgmr.msra.gmra.mxu3 %vm327_vm0, %v1087_v25  ;;  %v728_v12 = vpack.c.bf16 %v700_v4, %v699_v3  ;;  %v531_v25 = vld [vmem:[%s1325_s15 + $0x28] sm:$0xff]  ;;  %v787_v4 = vsel %vm327_vm0, %v733_v63, 0 }
  0x59   : > { %829 = vmatpush.bf16.xpose.msrb.mxu3 %v808_v13  ;;  %1035 = vmatmul.msk.bf16.vlgmr.msra.gmra.mxu0 %vm327_vm0, %v1089_v28  ;;  %v736_v13 = vpack.c.bf16 %v716_v7, %v715_v5  ;;  %v857_v7 = vld [vmem:[%s1510_s3 + $0x8] sm:$0xff] }
  0x5a   : > { %643 = vmatpush.bf16.xpose.msrb.mxu0 %v617_v14  ;;  %1037 = vmatmul.msk.bf16.vlgmr.msra.gmra.mxu1 %vm327_vm0, %v1089_v28  ;;  %v561_v14 = vpack.c.bf16 %v533_v9, %v532_v8  ;;  %v772_v16 = vsel %vm327_vm0, %v728_v12, 0  ;;  %v727_v28 = vpack.c.bf16 %v698_v20, %v697_v19  ;;  %v859_v8 = vld [vmem:[%s1510_s3 + $0x18] sm:$0xff]  ;;  %v1093_v9 = vld [vmem:[%s1360_s22 + $0x30] sm:$0xff]  ;;  %v1092_v12 = vld [vmem:[%s1360_s22 + $0x28] sm:$0xff] }
  0x5b   : > { %662 = vmatpush.bf16.xpose.msrb.mxu1 %v641_v18  ;;  %v796_v17 = vsel %vm327_vm0, %v736_v13, 0 }
  0x5c   : > { %v605_v18 = vsel %vm327_vm0, %v561_v14, 0 }
  0x60   : > { %811 = vmatpush.bf16.xpose.msrb.mxu2 %v781_v30  ;;  %v560_v30 = vpack.c.bf16 %v531_v25, %v530_v24 }
  0x61   : > { %830 = vmatpush.bf16.xpose.msrb.mxu3 %v805_v31  ;;  %v568_v31 = vpack.c.bf16 %v547_v27, %v546_v26 }
  0x62   : > { %644 = vmatpush.bf16.xpose.msrb.mxu0 %v614_v32  ;;  %v769_v32 = vsel %vm327_vm0, %v727_v28, 0  ;;  %v602_v34 = vsel %vm327_vm0, %v560_v30, 0 }
  0x63   : > { %663 = vmatpush.bf16.xpose.msrb.mxu1 %v638_v36  ;;  %v696_v36 = vld [vmem:[%s1314_s12 + $0x18] sm:$0xff]  ;;  %v626_v38 = vsel %vm327_vm0, %v568_v31, 0 }
  0x64   : > { %v726_v44 = vpack.c.bf16 %v696_v36, %v695_v35 }
  0x67   : > { %1048 = vmatmul.msk.bf16.gmra.mxu2 %vm327_vm0, %v1088_v59 }
  0x68   : > { %812 = vmatpush.bf16.xpose.msrb.mxu2 %v778_v46  ;;  %1050 = vmatmul.msk.bf16.gmra.mxu3 %vm327_vm0, %v1088_v59  ;;  %v559_v46 = vpack.c.bf16 %v529_v41, %v528_v40  ;;  %v543_v59 = vld [vmem:[%s1325_s15 + $0x88] sm:$0xff] }
  0x69   : > { %831 = vmatpush.bf16.xpose.msrb.mxu3 %v802_v47  ;;  %1036 = vmatmul.msk.bf16.gmra.mxu0 %vm327_vm0, %v1090_v62  ;;  %v567_v47 = vpack.c.bf16 %v545_v43, %v544_v42 }
  0x6a   : > { %645 = vmatpush.bf16.xpose.msrb.mxu0 %v611_v48  ;;  %1038 = vmatmul.msk.bf16.gmra.mxu1 %vm327_vm0, %v1090_v62  ;;  %v766_v48 = vsel %vm327_vm0, %v726_v44, 0  ;;  %v599_v50 = vsel %vm327_vm0, %v559_v46, 0  ;;  %v858_v62 = vld [vmem:[%s1510_s3 + $0x10] sm:$0xff] }
  0x6b   : > { %664 = vmatpush.bf16.xpose.msrb.mxu1 %v635_v52  ;;  %v694_v52 = vld [vmem:[%s1314_s12 + $0x8] sm:$0xff]  ;;  %v623_v54 = vsel %vm327_vm0, %v567_v47, 0 }
  0x6c   : > { %v725_v60 = vpack.c.bf16 %v694_v52, %v693_v51 }
  0x6e   : > { %v763_v3 = vsel %vm327_vm0, %v725_v60, 0 }
  0x70   : > { %813 = vmatpush.bf16.xpose.msrb.mxu2 %v775_v0  ;;  %v558_v0 = vpack.c.bf16 %v527_v57, %v526_v56 }
  0x71   : > { %832 = vmatpush.bf16.xpose.msrb.mxu3 %v799_v1  ;;  %v1162_v1 = vmov 0  }
  0x72   : > { %646 = vmatpush.bf16.xpose.msrb.mxu0 %v608_v2  ;;  %1121 = vset.pattern.permute.xlu0 %v1162_v1  ;;  %v566_v2 = vpack.c.bf16 %v543_v59, %v542_v58  ;;  %v596_v5 = vsel %vm327_vm0, %v558_v0, 0 }
  0x73   : > { %665 = vmatpush.bf16.xpose.msrb.mxu1 %v632_v6  ;;  %862 = vperm.xlu0 %1121, %v856_v61  }
  0x74   : > { %1122 = vset.pattern.permute.xlu1 %v1162_v1  ;;  %v620_v6 = vsel %vm327_vm0, %v566_v2, 0 }
  0x75   : > { %872 = vperm.xlu1 %1122, %v858_v62  }
  0x78   : > { %814 = vmatpush.bf16.xpose.msrb.mxu2 %v772_v16 }
  0x79   : > { %833 = vmatpush.bf16.xpose.msrb.mxu3 %v796_v17 }
  0x7a   : > { %647 = vmatpush.bf16.xpose.msrb.mxu0 %v605_v18 }
  0x7b   : > { %666 = vmatpush.bf16.xpose.msrb.mxu1 %v629_v22  ;;  %867 = vperm.xlu0 %1121, %v857_v7  }
  0x7d   : > { %877 = vperm.xlu1 %1122, %v859_v8  }
  0x80   : > { %815 = vmatpush.bf16.xpose.msrb.mxu2 %v769_v32 }
  0x81   : > { %834 = vmatpush.bf16.xpose.msrb.mxu3 %v793_v33 }
  0x82   : > { %648 = vmatpush.bf16.xpose.msrb.mxu0 %v602_v34 }
  0x83   : > { %667 = vmatpush.bf16.xpose.msrb.mxu1 %v626_v38 }
  0x88   : > { %816 = vmatpush.bf16.xpose.msrb.mxu2 %v766_v48 }
  0x89   : > { %835 = vmatpush.bf16.xpose.msrb.mxu3 %v790_v49 }
  0x8a   : > { %649 = vmatpush.bf16.xpose.msrb.mxu0 %v599_v50 }
  0x8b   : > { %668 = vmatpush.bf16.xpose.msrb.mxu1 %v623_v54 }
  0x90   : > { %817 = vmatpush.bf16.xpose.msrb.mxu2 %v763_v3 }
  0x91   : > { %836 = vmatpush.bf16.xpose.msrb.mxu3 %v787_v4 }
  0x92   : > { %650 = vmatpush.bf16.xpose.msrb.mxu0 %v596_v5 }
  0x93   : > { %669 = vmatpush.bf16.xpose.msrb.mxu1 %v620_v6 }
  0x97   : > { %1079 = vmatmul.msk.bf16.vlgmr.msrb.gmra.mxu2 %vm327_vm0, %v1093_v9 }
  0x98   : > { %1081 = vmatmul.msk.bf16.vlgmr.msrb.gmra.mxu3 %vm327_vm0, %v1093_v9 }
  0x99   : > { %1063 = vmatmul.msk.bf16.vlgmr.msrb.gmra.mxu0 %vm327_vm0, %v1091_v10 }
  0x9a   : > { %1065 = vmatmul.msk.bf16.vlgmr.msrb.gmra.mxu1 %vm327_vm0, %v1091_v10 }
  0xa7   : > { %1080 = vmatmul.msk.bf16.gmra.mxu2 %vm327_vm0, %v1094_v11 }
  0xa8   : > { %1082 = vmatmul.msk.bf16.gmra.mxu3 %vm327_vm0, %v1094_v11 }
  0xa9   : > { %1064 = vmatmul.msk.bf16.gmra.mxu0 %vm327_vm0, %v1092_v12 }
  0xaa   : > { %1066 = vmatmul.msk.bf16.gmra.mxu1 %vm327_vm0, %v1092_v12 }
  0xd6   : > { %v391_v13 = vpop.f32.mrf.mxu0 }
  0xd7   : > { %v410_v14 = vpop.f32.mrf.mxu1 }
  0xda   : > { %v493_v15 = vpop.f32.mrf.mxu2 }
  0xdb   : > { %v512_v16 = vpop.f32.mrf.mxu3  ;;  %v494_v31 = vadd.f32 %v493_v15, %v391_v13 }
  0xdc   : > { %v513_v32 = vadd.f32 %v512_v16, %v410_v14 }
  0xde   : > { %v393_v17 = vpop.f32.mrf.mxu0 }
  0xdf   : > { %v412_v18 = vpop.f32.mrf.mxu1 }
  0xe2   : > { %v495_v19 = vpop.f32.mrf.mxu2 }
  0xe3   : > { %v514_v20 = vpop.f32.mrf.mxu3  ;;  %v496_v44 = vadd.f32 %v495_v19, %v393_v17 }
  0xe4   : > { %v515_v46 = vadd.f32 %v514_v20, %v412_v18 }
  0xe5   : > { %v863_v33 = vpop.permute.xlu0 %862 }
  0xe6   : > { %v396_v21 = vpop.f32.mrf.mxu0 }
  0xe7   : > { %v415_v22 = vpop.f32.mrf.mxu1  ;;  %v873_v3 = vpop.permute.xlu1 %872 }
  0xea   : > { %v498_v23 = vpop.f32.mrf.mxu2 }
  0xeb   : > { %v517_v24 = vpop.f32.mrf.mxu3  ;;  %v499_v61 = vadd.f32 %v498_v23, %v396_v21 }
  0xec   : > { %v518_v63 = vadd.f32 %v517_v24, %v415_v22 }
  0xed   : > { %v868_v53 = vpop.permute.xlu0 %867 }
  0xee   : > { %v398_v25 = vpop.f32.mrf.mxu0 }
  0xef   : > { %v1480_v26 = vpop.f32.mrf.mxu1 }
  0xf2   : > { %v500_v27 = vpop.f32.mrf.mxu2 }
  0xf3   : > { %v519_v28 = vpop.f32.mrf.mxu3  ;;  %v501_v13 = vadd.f32 %v500_v27, %v398_v25 }
  0xf4   : > { %v520_v16 = vadd.f32 %v519_v28, %v1480_v26 }
 0x116   : > { %v652_v29 = vpop.f32.mrf.mxu0 }
 0x117   : > { %v671_v30 = vpop.f32.mrf.mxu1  ;;  %v681_v34 = vadd.f32 %v652_v29, %v494_v31  ;;  %v878_v29 = vpop.permute.xlu1 %877 }
 0x118   : > { %v682_v35 = vadd.f32 %v671_v30, %v513_v32 }
 0x11a   : > { %v819_v36 = vpop.f32.mrf.mxu2 }
 0x11b   : > { %v848_v37 = vadd.f32 %v819_v36, %v681_v34  ;;  %v838_v38 = vpop.f32.mrf.mxu3 }
 0x11c   : > { %v849_v39 = vadd.f32 %v838_v38, %v682_v35 }
 0x11d   : > { %v880_v40 = vadd.f32 %v863_v33, %v848_v37 }
 0x11e   : > { %v654_v41 = vpop.f32.mrf.mxu0  ;;  %v881_v42 = vadd.f32 %v863_v33, %v849_v39 }
 0x11f   : > { %v673_v43 = vpop.f32.mrf.mxu1  ;;  %vm888_vm1 = vcmp.ge.f32.partialorder %v880_v40, 0.0  ;;  %v896_v45 = vmul.f32 0.2, %v880_v40  ;;  %v683_v49 = vadd.f32 %v654_v41, %v496_v44 }
 0x120   : > { %vm889_vm2 = vcmp.ge.f32.partialorder %v881_v42, 0.0  ;;  %v897_v47 = vmul.f32 0.2, %v881_v42  ;;  %v684_v51 = vadd.f32 %v673_v43, %v515_v46 }
 0x121   : > { %v904_v48 = vsel %vm888_vm1, %v880_v40, %v896_v45 }
 0x122   : > { %v905_v50 = vsel %vm889_vm2, %v881_v42, %v897_v47  ;;  %912 = vst [vmem:[%s1487_s7] sm:$0xff] %v904_v48  ;;  %v821_v52 = vpop.f32.mrf.mxu2 }
 0x123   : > { %913 = vst [vmem:[%s1487_s7 + $0x8] sm:$0xff] %v905_v50  ;;  %v850_v54 = vadd.f32 %v821_v52, %v683_v49  ;;  %v840_v55 = vpop.f32.mrf.mxu3 }
 0x124   : > { %v851_v56 = vadd.f32 %v840_v55, %v684_v51 }
 0x125   : > { %v882_v57 = vadd.f32 %v868_v53, %v850_v54 }
 0x126   : > { %v657_v58 = vpop.f32.mrf.mxu0  ;;  %v883_v59 = vadd.f32 %v868_v53, %v851_v56 }
 0x127   : > { %v676_v60 = vpop.f32.mrf.mxu1  ;;  %vm890_vm3 = vcmp.ge.f32.partialorder %v882_v57, 0.0  ;;  %v898_v62 = vmul.f32 0.2, %v882_v57  ;;  %v685_v2 = vadd.f32 %v657_v58, %v499_v61 }
 0x128   : > { %vm891_vm4 = vcmp.ge.f32.partialorder %v883_v59, 0.0  ;;  %v899_v0 = vmul.f32 0.2, %v883_v59  ;;  %v686_v5 = vadd.f32 %v676_v60, %v518_v63 }
 0x129   : > { %v906_v1 = vsel %vm890_vm3, %v882_v57, %v898_v62 }
 0x12a   : > { %v907_v4 = vsel %vm891_vm4, %v883_v59, %v899_v0  ;;  %914 = vst [vmem:[%s1487_s7 + $0x10] sm:$0xff] %v906_v1  ;;  %v824_v6 = vpop.f32.mrf.mxu2 }
 0x12b   : > { %915 = vst [vmem:[%s1487_s7 + $0x18] sm:$0xff] %v907_v4  ;;  %v852_v7 = vadd.f32 %v824_v6, %v685_v2  ;;  %v843_v8 = vpop.f32.mrf.mxu3 }
 0x12c   : > { %v853_v9 = vadd.f32 %v843_v8, %v686_v5 }
 0x12d   : > { %v884_v10 = vadd.f32 %v873_v3, %v852_v7 }
 0x12e   : > { %v885_v11 = vadd.f32 %v873_v3, %v853_v9  ;;  %v659_v12 = vpop.f32.mrf.mxu0 }
 0x12f   : > { %vm892_vm5 = vcmp.ge.f32.partialorder %v884_v10, 0.0  ;;  %v900_v14 = vmul.f32 0.2, %v884_v10  ;;  %v678_v15 = vpop.f32.mrf.mxu1  ;;  %v687_v19 = vadd.f32 %v659_v12, %v501_v13 }
 0x130   : > { %vm893_vm6 = vcmp.ge.f32.partialorder %v885_v11, 0.0  ;;  %v901_v17 = vmul.f32 0.2, %v885_v11  ;;  %v688_v21 = vadd.f32 %v678_v15, %v520_v16 }
 0x131   : > { %v908_v18 = vsel %vm892_vm5, %v884_v10, %v900_v14 }
 0x132   : > { %916 = vst [vmem:[%s1487_s7 + $0x20] sm:$0xff] %v908_v18  ;;  %v909_v20 = vsel %vm893_vm6, %v885_v11, %v901_v17  ;;  %v826_v22 = vpop.f32.mrf.mxu2 }
 0x133   : > { %917 = vst [vmem:[%s1487_s7 + $0x28] sm:$0xff] %v909_v20  ;;  %v854_v23 = vadd.f32 %v826_v22, %v687_v19  ;;  %v845_v24 = vpop.f32.mrf.mxu3 }
 0x134   : > { %v855_v25 = vadd.f32 %v845_v24, %v688_v21 }
 0x135   : > { %v886_v27 = vadd.f32 %v878_v29, %v854_v23 }
 0x136   : > { %v887_v30 = vadd.f32 %v878_v29, %v855_v25 }
 0x137   : > { %vm894_vm7 = vcmp.ge.f32.partialorder %v886_v27, 0.0  ;;  %v902_v31 = vmul.f32 0.2, %v886_v27 }
 0x138   : > { %vm895_vm8 = vcmp.ge.f32.partialorder %v887_v30, 0.0  ;;  %v903_v26 = vmul.f32 0.2, %v887_v30 }
 0x139   : > { %v910_v28 = vsel %vm894_vm7, %v886_v27, %v902_v31 }
 0x13a   : > { %918 = vst [vmem:[%s1487_s7 + $0x30] sm:$0xff] %v910_v28  ;;  %v911_v32 = vsel %vm895_vm8, %v887_v30, %v903_v26 }
 0x13b   : > { %919 = vst [vmem:[%s1487_s7 + $0x38] sm:$0xff] %v911_v32 }
 0x13c PF: > { %s22_s21 = sadd.s32 1, %s1159_s21   ;;  %s1512_s19 = smov %s1155_s20 }
 0x13d   : > { %p19_p5 = scmp.ge.s32.totalorder %s22_s21, 6   ;;  %s1513_s20 = smov %s1515_s0 }
 0x13f   :  { %21 = sbr.rel (!%p19_p5) target bundleno = 8 (0x8), region = 69 }

</bundles_post_ra>
